<compile_context>
chip_gen: v6e
topology: v6e:2x2x1
jax: 0.10.0
libtpu: 0.0.40
codegen_flags: <defaults>
</compile_context>

<pallas_src>
import functools

import jax
import jax.numpy as jnp
from jax import lax
from jax.experimental import pallas as pl
from jax.experimental.pallas import tpu as pltpu


def _gru_policy_kernel(x_ref,        # (seq, input_dim)  f32
                       p_ref,        # (R, W) packed parameter slab  f32
                       out_ref,      # (seq, out_dim)    f32
                       *, input_dim, H, out_dim, offs):
    r_wx, r_wh, r_b, r_wl, r_bl = offs

    x = x_ref[...]                                          # (seq, input_dim)
    wx = p_ref[r_wx:r_wx + input_dim, 0:3 * H]              # (input_dim, 3H)
    wh = p_ref[r_wh:r_wh + H, 0:3 * H]                      # (H, 3H)
    b_rzn = p_ref[r_b:r_b + 1, 0:3 * H]                     # (1, 3H)
    b_hn = p_ref[r_b:r_b + 1, 3 * H:4 * H]                  # (1, H)
    wlin = p_ref[r_wl:r_wl + H, 0:out_dim]                  # (H, out_dim)
    blin = p_ref[r_bl:r_bl + 1, 0:out_dim]                  # (1, out_dim)

    seq = x.shape[0]

    # Fused input projection for all timesteps + all three gates: one MXU pass.
    xproj = jnp.dot(x, wx, preferred_element_type=jnp.float32) + b_rzn  # (seq, 3H)
    # Hoisted gate lane-slices (one-time, not per recurrence step).
    xp_r = xproj[:, 0:H]
    xp_z = xproj[:, H:2 * H]
    xp_n = xproj[:, 2 * H:3 * H]

    # t = 0: h0 == 0 -> skip the recurrent matmul entirely.
    r0 = jax.nn.sigmoid(xp_r[0:1, :])
    z0 = jax.nn.sigmoid(xp_z[0:1, :])
    n0 = jnp.tanh(xp_n[0:1, :] + r0 * b_hn)
    h = (1.0 - z0) * n0
    hs = [h]

    # Fully unrolled GRU recurrence (PyTorch gate order r, z, n).
    for t in range(1, seq):  # seq is static -> unrolled, all slices static
        hp = jnp.dot(h, wh, preferred_element_type=jnp.float32)     # (1, 3H)
        r = jax.nn.sigmoid(xp_r[t:t + 1, :] + hp[:, 0:H])
        z = jax.nn.sigmoid(xp_z[t:t + 1, :] + hp[:, H:2 * H])
        n = jnp.tanh(xp_n[t:t + 1, :] + r * (hp[:, 2 * H:3 * H] + b_hn))
        h = (1.0 - z) * n + z * h
        hs.append(h)
    h_all = jnp.concatenate(hs, axis=0)                              # (seq, H)

    # Linear head.
    logits = jnp.dot(h_all, wlin, preferred_element_type=jnp.float32) + blin

    if out_dim == 2:
        # Exact two-class softmax: no cross-lane reductions, rows sum to 1.
        d = logits[:, 0:1] - logits[:, 1:2]
        p0 = jax.nn.sigmoid(d)
        out_ref[...] = jnp.concatenate([p0, 1.0 - p0], axis=1)
    else:
        m = jnp.max(logits, axis=1, keepdims=True)
        e = jnp.exp(logits - m)
        out_ref[...] = e / jnp.sum(e, axis=1, keepdims=True)


def _round_up(n, m):
    return ((n + m - 1) // m) * m


def pack_params(params):
    """Host-side fusion of the 13 PyTorch tensors into a single (R, W) slab.

    Layout (rows, all sections padded to multiples of 8 sublanes, W lanes):
      [r_wx : r_wx+input_dim, 0:3H]   w_ir | w_iz | w_in   (transposed)
      [r_wh : r_wh+H,         0:3H]   w_hr | w_hz | w_hn   (transposed)
      [r_b,                   0:4H]   b_ir+b_hr | b_iz+b_hz | b_in | b_hn
      [r_wl : r_wl+H,         0:out]  linear weight (transposed)
      [r_bl,                  0:out]  linear bias
    """
    input_dim = params["w_ir_t"].shape[0]
    H = params["w_hr_t"].shape[0]
    out_dim = params["w_lin_t"].shape[1]

    W = _round_up(max(4 * H, out_dim), 128)
    rows_wx = _round_up(input_dim, 8)
    rows_wh = _round_up(H, 8)
    rows_wl = _round_up(H, 8)
    r_wx = 0
    r_wh = r_wx + rows_wx
    r_b = r_wh + rows_wh
    r_wl = r_b + 8
    r_bl = r_wl + rows_wl
    R = r_bl + 8

    wx = jnp.concatenate(
        [params["w_ir_t"], params["w_iz_t"], params["w_in_t"]], axis=1)
    wh = jnp.concatenate(
        [params["w_hr_t"], params["w_hz_t"], params["w_hn_t"]], axis=1)
    b = jnp.concatenate(
        [params["b_r"], params["b_z"], params["b_in"], params["b_hn"]], axis=1)

    slab = jnp.zeros((R, W), jnp.float32)
    slab = slab.at[r_wx:r_wx + input_dim, 0:3 * H].set(wx)
    slab = slab.at[r_wh:r_wh + H, 0:3 * H].set(wh)
    slab = slab.at[r_b:r_b + 1, 0:4 * H].set(b)
    slab = slab.at[r_wl:r_wl + H, 0:out_dim].set(params["w_lin_t"])
    slab = slab.at[r_bl:r_bl + 1, 0:out_dim].set(params["b_lin"])

    meta = dict(input_dim=input_dim, H=H, out_dim=out_dim,
                offs=(r_wx, r_wh, r_b, r_wl, r_bl))
    return slab, meta


def rds_policy_forward(x, slab, meta):
    """x: (seq, input_dim) float32 -> (seq, output_dim) float32."""
    seq = x.shape[0]
    out_dim = meta["out_dim"]
    kernel = functools.partial(_gru_policy_kernel, **meta)
    vmem_spec = pl.BlockSpec(memory_space=pltpu.MemorySpace.VMEM)
    return pl.pallas_call(
        kernel,
        out_shape=jax.ShapeDtypeStruct((seq, out_dim), jnp.float32),
        in_specs=[vmem_spec, vmem_spec],
        out_specs=vmem_spec,
    )(x, slab)


def rds_policy_reference(x, params):
    """Pure-JAX reference of the PyTorch forward (for validation)."""
    H = params["w_ir_t"].shape[1]

    def step(h, x_t):
        x_t = x_t[None, :]
        r = jax.nn.sigmoid(x_t @ params["w_ir_t"] + params["b_r"] + h @ params["w_hr_t"])
        z = jax.nn.sigmoid(x_t @ params["w_iz_t"] + params["b_z"] + h @ params["w_hz_t"])
        n = jnp.tanh(x_t @ params["w_in_t"] + params["b_in"]
                     + r * (h @ params["w_hn_t"] + params["b_hn"]))
        h_new = (1.0 - z) * n + z * h
        return h_new, h_new[0]

    h0 = jnp.zeros((1, H), jnp.float32)
    _, hs = lax.scan(step, h0, x)
    logits = hs @ params["w_lin_t"] + params["b_lin"]
    return jax.nn.softmax(logits, axis=1)


def init_params(key, input_dim, hidden_dim, output_dim):
    """Deterministic init mimicking PyTorch U(-1/sqrt(H), 1/sqrt(H))."""
    k = 1.0 / jnp.sqrt(jnp.float32(hidden_dim))
    keys = jax.random.split(key, 12)

    def u(kk, shape):
        return jax.random.uniform(kk, shape, jnp.float32, -k, k)

    # torch GRU gate order is (r, z, n); weights stored as (H, F) -> pass transposed.
    params = {
        "w_ir_t": u(keys[0], (input_dim, hidden_dim)),
        "w_iz_t": u(keys[1], (input_dim, hidden_dim)),
        "w_in_t": u(keys[2], (input_dim, hidden_dim)),
        "w_hr_t": u(keys[3], (hidden_dim, hidden_dim)),
        "w_hz_t": u(keys[4], (hidden_dim, hidden_dim)),
        "w_hn_t": u(keys[5], (hidden_dim, hidden_dim)),
        # b_r = b_ir + b_hr, b_z = b_iz + b_hz can be fused; b_in / b_hn must
        # stay separate because b_hn sits inside the r-gated term.
        "b_r":  u(keys[6], (1, hidden_dim)) + u(keys[7], (1, hidden_dim)),
        "b_z":  u(keys[8], (1, hidden_dim)) + u(keys[9], (1, hidden_dim)),
        "b_in": u(keys[10], (1, hidden_dim)),
        "b_hn": u(keys[11], (1, hidden_dim)),
    }
    klin = 1.0 / jnp.sqrt(jnp.float32(hidden_dim))
    k2 = jax.random.split(jax.random.fold_in(key, 123), 2)
    params["w_lin_t"] = jax.random.uniform(k2[0], (hidden_dim, output_dim),
                                           jnp.float32, -klin, klin)
    params["b_lin"] = jax.random.uniform(k2[1], (1, output_dim),
                                         jnp.float32, -klin, klin)
    return params


if __name__ == "__main__":
    seq, input_dim, hidden_dim, output_dim = 8, 16, 32, 2

    key = jax.random.PRNGKey(0)
    kx, kp = jax.random.split(key)
    x = jax.random.normal(kx, (seq, input_dim), jnp.float32)
    params = init_params(kp, input_dim, hidden_dim, output_dim)
    slab, meta = pack_params(params)
    slab = jax.block_until_ready(slab)

    out = jax.block_until_ready(rds_policy_forward(x, slab, meta))
    ref = jax.block_until_ready(rds_policy_reference(x, params))

    assert out.shape == (seq, output_dim)
    assert jnp.allclose(out, ref, atol=1e-5, rtol=1e-5), (out, ref)
    # Softmax rows should sum to 1.
    assert jnp.allclose(jnp.sum(out, axis=1), jnp.ones((seq,)), atol=1e-5)

    print("KERNEL_OK")
</pallas_src>

<mosaic_0001>
module attributes {stable_mosaic.version = 11 : i64} {
  func.func @_gru_policy_kernel(%arg0: memref<8x16xf32, #tpu.memory_space<vmem>>, %arg1: memref<96x128xf32, #tpu.memory_space<vmem>>, %arg2: memref<8x2xf32, #tpu.memory_space<vmem>>) attributes {dimension_semantics = [], scalar_prefetch = 0 : i64, scratch_operands = 0 : i64, tpu.core_type = #tpu.core_type<tc>} {
    %c0 = arith.constant 0 : index
    %c0_0 = arith.constant 0 : index
    %0 = vector.load %arg0[%c0, %c0_0] : memref<8x16xf32, #tpu.memory_space<vmem>>, vector<8x16xf32>
    %c0_1 = arith.constant 0 : index
    %c0_2 = arith.constant 0 : index
    %1 = vector.load %arg1[%c0_1, %c0_2] : memref<96x128xf32, #tpu.memory_space<vmem>>, vector<16x96xf32>
    %c16 = arith.constant 16 : index
    %c0_3 = arith.constant 0 : index
    %2 = vector.load %arg1[%c16, %c0_3] : memref<96x128xf32, #tpu.memory_space<vmem>>, vector<32x96xf32>
    %c48 = arith.constant 48 : index
    %c0_4 = arith.constant 0 : index
    %3 = vector.load %arg1[%c48, %c0_4] : memref<96x128xf32, #tpu.memory_space<vmem>>, vector<1x96xf32>
    %c48_5 = arith.constant 48 : index
    %c96 = arith.constant 96 : index
    %4 = vector.load %arg1[%c48_5, %c96] : memref<96x128xf32, #tpu.memory_space<vmem>>, vector<1x32xf32>
    %c56 = arith.constant 56 : index
    %c0_6 = arith.constant 0 : index
    %5 = vector.load %arg1[%c56, %c0_6] : memref<96x128xf32, #tpu.memory_space<vmem>>, vector<32x2xf32>
    %c88 = arith.constant 88 : index
    %c0_7 = arith.constant 0 : index
    %6 = vector.load %arg1[%c88, %c0_7] : memref<96x128xf32, #tpu.memory_space<vmem>>, vector<1x2xf32>
    %cst = arith.constant dense<0.000000e+00> : vector<8x96xf32>
    %7 = tpu.matmul %0, %1, %cst {dimension_numbers = #tpu.dot_dimension_numbers<[1], [0], [0], [1], [0, 0, 1, 1], [], []>} : vector<8x16xf32>, vector<16x96xf32>, vector<8x96xf32> -> vector<8x96xf32>
    %8 = vector.broadcast %3 : vector<1x96xf32> to vector<8x96xf32>
    %9 = arith.addf %7, %8 : vector<8x96xf32>
    %10 = vector.extract_strided_slice %9 {offsets = [0, 0], sizes = [8, 32], strides = [1, 1]} : vector<8x96xf32> to vector<8x32xf32>
    %11 = vector.extract_strided_slice %9 {offsets = [0, 32], sizes = [8, 32], strides = [1, 1]} : vector<8x96xf32> to vector<8x32xf32>
    %12 = vector.extract_strided_slice %9 {offsets = [0, 64], sizes = [8, 32], strides = [1, 1]} : vector<8x96xf32> to vector<8x32xf32>
    %13 = vector.extract_strided_slice %10 {offsets = [0, 0], sizes = [1, 32], strides = [1, 1]} : vector<8x32xf32> to vector<1x32xf32>
    %14 = arith.negf %13 : vector<1x32xf32>
    %15 = math.exp %14 : vector<1x32xf32>
    %cst_8 = arith.constant 1.000000e+00 : f32
    %16 = vector.broadcast %cst_8 : f32 to vector<1x32xf32>
    %17 = arith.addf %16, %15 : vector<1x32xf32>
    %18 = arith.divf %16, %17 : vector<1x32xf32>
    %19 = vector.extract_strided_slice %11 {offsets = [0, 0], sizes = [1, 32], strides = [1, 1]} : vector<8x32xf32> to vector<1x32xf32>
    %20 = arith.negf %19 : vector<1x32xf32>
    %21 = math.exp %20 : vector<1x32xf32>
    %cst_9 = arith.constant 1.000000e+00 : f32
    %22 = vector.broadcast %cst_9 : f32 to vector<1x32xf32>
    %23 = arith.addf %22, %21 : vector<1x32xf32>
    %24 = arith.divf %22, %23 : vector<1x32xf32>
    %25 = vector.extract_strided_slice %12 {offsets = [0, 0], sizes = [1, 32], strides = [1, 1]} : vector<8x32xf32> to vector<1x32xf32>
    %26 = arith.mulf %18, %4 : vector<1x32xf32>
    %27 = arith.addf %25, %26 : vector<1x32xf32>
    %28 = math.tanh %27 : vector<1x32xf32>
    %cst_10 = arith.constant 1.000000e+00 : f32
    %29 = vector.broadcast %cst_10 : f32 to vector<1x32xf32>
    %30 = arith.subf %29, %24 : vector<1x32xf32>
    %31 = arith.mulf %30, %28 : vector<1x32xf32>
    %cst_11 = arith.constant dense<0.000000e+00> : vector<1x96xf32>
    %32 = tpu.matmul %31, %2, %cst_11 {dimension_numbers = #tpu.dot_dimension_numbers<[1], [0], [0], [1], [0, 0, 1, 1], [], []>} : vector<1x32xf32>, vector<32x96xf32>, vector<1x96xf32> -> vector<1x96xf32>
    %33 = vector.extract_strided_slice %10 {offsets = [1, 0], sizes = [1, 32], strides = [1, 1]} : vector<8x32xf32> to vector<1x32xf32>
    %34 = vector.extract_strided_slice %32 {offsets = [0, 0], sizes = [1, 32], strides = [1, 1]} : vector<1x96xf32> to vector<1x32xf32>
    %35 = arith.addf %33, %34 : vector<1x32xf32>
    %36 = arith.negf %35 : vector<1x32xf32>
    %37 = math.exp %36 : vector<1x32xf32>
    %cst_12 = arith.constant 1.000000e+00 : f32
    %38 = vector.broadcast %cst_12 : f32 to vector<1x32xf32>
    %39 = arith.addf %38, %37 : vector<1x32xf32>
    %40 = arith.divf %38, %39 : vector<1x32xf32>
    %41 = vector.extract_strided_slice %11 {offsets = [1, 0], sizes = [1, 32], strides = [1, 1]} : vector<8x32xf32> to vector<1x32xf32>
    %42 = vector.extract_strided_slice %32 {offsets = [0, 32], sizes = [1, 32], strides = [1, 1]} : vector<1x96xf32> to vector<1x32xf32>
    %43 = arith.addf %41, %42 : vector<1x32xf32>
    %44 = arith.negf %43 : vector<1x32xf32>
    %45 = math.exp %44 : vector<1x32xf32>
    %cst_13 = arith.constant 1.000000e+00 : f32
    %46 = vector.broadcast %cst_13 : f32 to vector<1x32xf32>
    %47 = arith.addf %46, %45 : vector<1x32xf32>
    %48 = arith.divf %46, %47 : vector<1x32xf32>
    %49 = vector.extract_strided_slice %12 {offsets = [1, 0], sizes = [1, 32], strides = [1, 1]} : vector<8x32xf32> to vector<1x32xf32>
    %50 = vector.extract_strided_slice %32 {offsets = [0, 64], sizes = [1, 32], strides = [1, 1]} : vector<1x96xf32> to vector<1x32xf32>
    %51 = arith.addf %50, %4 : vector<1x32xf32>
    %52 = arith.mulf %40, %51 : vector<1x32xf32>
    %53 = arith.addf %49, %52 : vector<1x32xf32>
    %54 = math.tanh %53 : vector<1x32xf32>
    %cst_14 = arith.constant 1.000000e+00 : f32
    %55 = vector.broadcast %cst_14 : f32 to vector<1x32xf32>
    %56 = arith.subf %55, %48 : vector<1x32xf32>
    %57 = arith.mulf %56, %54 : vector<1x32xf32>
    %58 = arith.mulf %48, %31 : vector<1x32xf32>
    %59 = arith.addf %57, %58 : vector<1x32xf32>
    %cst_15 = arith.constant dense<0.000000e+00> : vector<1x96xf32>
    %60 = tpu.matmul %59, %2, %cst_15 {dimension_numbers = #tpu.dot_dimension_numbers<[1], [0], [0], [1], [0, 0, 1, 1], [], []>} : vector<1x32xf32>, vector<32x96xf32>, vector<1x96xf32> -> vector<1x96xf32>
    %61 = vector.extract_strided_slice %10 {offsets = [2, 0], sizes = [1, 32], strides = [1, 1]} : vector<8x32xf32> to vector<1x32xf32>
    %62 = vector.extract_strided_slice %60 {offsets = [0, 0], sizes = [1, 32], strides = [1, 1]} : vector<1x96xf32> to vector<1x32xf32>
    %63 = arith.addf %61, %62 : vector<1x32xf32>
    %64 = arith.negf %63 : vector<1x32xf32>
    %65 = math.exp %64 : vector<1x32xf32>
    %cst_16 = arith.constant 1.000000e+00 : f32
    %66 = vector.broadcast %cst_16 : f32 to vector<1x32xf32>
    %67 = arith.addf %66, %65 : vector<1x32xf32>
    %68 = arith.divf %66, %67 : vector<1x32xf32>
    %69 = vector.extract_strided_slice %11 {offsets = [2, 0], sizes = [1, 32], strides = [1, 1]} : vector<8x32xf32> to vector<1x32xf32>
    %70 = vector.extract_strided_slice %60 {offsets = [0, 32], sizes = [1, 32], strides = [1, 1]} : vector<1x96xf32> to vector<1x32xf32>
    %71 = arith.addf %69, %70 : vector<1x32xf32>
    %72 = arith.negf %71 : vector<1x32xf32>
    %73 = math.exp %72 : vector<1x32xf32>
    %cst_17 = arith.constant 1.000000e+00 : f32
    %74 = vector.broadcast %cst_17 : f32 to vector<1x32xf32>
    %75 = arith.addf %74, %73 : vector<1x32xf32>
    %76 = arith.divf %74, %75 : vector<1x32xf32>
    %77 = vector.extract_strided_slice %12 {offsets = [2, 0], sizes = [1, 32], strides = [1, 1]} : vector<8x32xf32> to vector<1x32xf32>
    %78 = vector.extract_strided_slice %60 {offsets = [0, 64], sizes = [1, 32], strides = [1, 1]} : vector<1x96xf32> to vector<1x32xf32>
    %79 = arith.addf %78, %4 : vector<1x32xf32>
    %80 = arith.mulf %68, %79 : vector<1x32xf32>
    %81 = arith.addf %77, %80 : vector<1x32xf32>
    %82 = math.tanh %81 : vector<1x32xf32>
    %cst_18 = arith.constant 1.000000e+00 : f32
    %83 = vector.broadcast %cst_18 : f32 to vector<1x32xf32>
    %84 = arith.subf %83, %76 : vector<1x32xf32>
    %85 = arith.mulf %84, %82 : vector<1x32xf32>
    %86 = arith.mulf %76, %59 : vector<1x32xf32>
    %87 = arith.addf %85, %86 : vector<1x32xf32>
    %cst_19 = arith.constant dense<0.000000e+00> : vector<1x96xf32>
    %88 = tpu.matmul %87, %2, %cst_19 {dimension_numbers = #tpu.dot_dimension_numbers<[1], [0], [0], [1], [0, 0, 1, 1], [], []>} : vector<1x32xf32>, vector<32x96xf32>, vector<1x96xf32> -> vector<1x96xf32>
    %89 = vector.extract_strided_slice %10 {offsets = [3, 0], sizes = [1, 32], strides = [1, 1]} : vector<8x32xf32> to vector<1x32xf32>
    %90 = vector.extract_strided_slice %88 {offsets = [0, 0], sizes = [1, 32], strides = [1, 1]} : vector<1x96xf32> to vector<1x32xf32>
    %91 = arith.addf %89, %90 : vector<1x32xf32>
    %92 = arith.negf %91 : vector<1x32xf32>
    %93 = math.exp %92 : vector<1x32xf32>
    %cst_20 = arith.constant 1.000000e+00 : f32
    %94 = vector.broadcast %cst_20 : f32 to vector<1x32xf32>
    %95 = arith.addf %94, %93 : vector<1x32xf32>
    %96 = arith.divf %94, %95 : vector<1x32xf32>
    %97 = vector.extract_strided_slice %11 {offsets = [3, 0], sizes = [1, 32], strides = [1, 1]} : vector<8x32xf32> to vector<1x32xf32>
    %98 = vector.extract_strided_slice %88 {offsets = [0, 32], sizes = [1, 32], strides = [1, 1]} : vector<1x96xf32> to vector<1x32xf32>
    %99 = arith.addf %97, %98 : vector<1x32xf32>
    %100 = arith.negf %99 : vector<1x32xf32>
    %101 = math.exp %100 : vector<1x32xf32>
    %cst_21 = arith.constant 1.000000e+00 : f32
    %102 = vector.broadcast %cst_21 : f32 to vector<1x32xf32>
    %103 = arith.addf %102, %101 : vector<1x32xf32>
    %104 = arith.divf %102, %103 : vector<1x32xf32>
    %105 = vector.extract_strided_slice %12 {offsets = [3, 0], sizes = [1, 32], strides = [1, 1]} : vector<8x32xf32> to vector<1x32xf32>
    %106 = vector.extract_strided_slice %88 {offsets = [0, 64], sizes = [1, 32], strides = [1, 1]} : vector<1x96xf32> to vector<1x32xf32>
    %107 = arith.addf %106, %4 : vector<1x32xf32>
    %108 = arith.mulf %96, %107 : vector<1x32xf32>
    %109 = arith.addf %105, %108 : vector<1x32xf32>
    %110 = math.tanh %109 : vector<1x32xf32>
    %cst_22 = arith.constant 1.000000e+00 : f32
    %111 = vector.broadcast %cst_22 : f32 to vector<1x32xf32>
    %112 = arith.subf %111, %104 : vector<1x32xf32>
    %113 = arith.mulf %112, %110 : vector<1x32xf32>
    %114 = arith.mulf %104, %87 : vector<1x32xf32>
    %115 = arith.addf %113, %114 : vector<1x32xf32>
    %cst_23 = arith.constant dense<0.000000e+00> : vector<1x96xf32>
    %116 = tpu.matmul %115, %2, %cst_23 {dimension_numbers = #tpu.dot_dimension_numbers<[1], [0], [0], [1], [0, 0, 1, 1], [], []>} : vector<1x32xf32>, vector<32x96xf32>, vector<1x96xf32> -> vector<1x96xf32>
    %117 = vector.extract_strided_slice %10 {offsets = [4, 0], sizes = [1, 32], strides = [1, 1]} : vector<8x32xf32> to vector<1x32xf32>
    %118 = vector.extract_strided_slice %116 {offsets = [0, 0], sizes = [1, 32], strides = [1, 1]} : vector<1x96xf32> to vector<1x32xf32>
    %119 = arith.addf %117, %118 : vector<1x32xf32>
    %120 = arith.negf %119 : vector<1x32xf32>
    %121 = math.exp %120 : vector<1x32xf32>
    %cst_24 = arith.constant 1.000000e+00 : f32
    %122 = vector.broadcast %cst_24 : f32 to vector<1x32xf32>
    %123 = arith.addf %122, %121 : vector<1x32xf32>
    %124 = arith.divf %122, %123 : vector<1x32xf32>
    %125 = vector.extract_strided_slice %11 {offsets = [4, 0], sizes = [1, 32], strides = [1, 1]} : vector<8x32xf32> to vector<1x32xf32>
    %126 = vector.extract_strided_slice %116 {offsets = [0, 32], sizes = [1, 32], strides = [1, 1]} : vector<1x96xf32> to vector<1x32xf32>
    %127 = arith.addf %125, %126 : vector<1x32xf32>
    %128 = arith.negf %127 : vector<1x32xf32>
    %129 = math.exp %128 : vector<1x32xf32>
    %cst_25 = arith.constant 1.000000e+00 : f32
    %130 = vector.broadcast %cst_25 : f32 to vector<1x32xf32>
    %131 = arith.addf %130, %129 : vector<1x32xf32>
    %132 = arith.divf %130, %131 : vector<1x32xf32>
    %133 = vector.extract_strided_slice %12 {offsets = [4, 0], sizes = [1, 32], strides = [1, 1]} : vector<8x32xf32> to vector<1x32xf32>
    %134 = vector.extract_strided_slice %116 {offsets = [0, 64], sizes = [1, 32], strides = [1, 1]} : vector<1x96xf32> to vector<1x32xf32>
    %135 = arith.addf %134, %4 : vector<1x32xf32>
    %136 = arith.mulf %124, %135 : vector<1x32xf32>
    %137 = arith.addf %133, %136 : vector<1x32xf32>
    %138 = math.tanh %137 : vector<1x32xf32>
    %cst_26 = arith.constant 1.000000e+00 : f32
    %139 = vector.broadcast %cst_26 : f32 to vector<1x32xf32>
    %140 = arith.subf %139, %132 : vector<1x32xf32>
    %141 = arith.mulf %140, %138 : vector<1x32xf32>
    %142 = arith.mulf %132, %115 : vector<1x32xf32>
    %143 = arith.addf %141, %142 : vector<1x32xf32>
    %cst_27 = arith.constant dense<0.000000e+00> : vector<1x96xf32>
    %144 = tpu.matmul %143, %2, %cst_27 {dimension_numbers = #tpu.dot_dimension_numbers<[1], [0], [0], [1], [0, 0, 1, 1], [], []>} : vector<1x32xf32>, vector<32x96xf32>, vector<1x96xf32> -> vector<1x96xf32>
    %145 = vector.extract_strided_slice %10 {offsets = [5, 0], sizes = [1, 32], strides = [1, 1]} : vector<8x32xf32> to vector<1x32xf32>
    %146 = vector.extract_strided_slice %144 {offsets = [0, 0], sizes = [1, 32], strides = [1, 1]} : vector<1x96xf32> to vector<1x32xf32>
    %147 = arith.addf %145, %146 : vector<1x32xf32>
    %148 = arith.negf %147 : vector<1x32xf32>
    %149 = math.exp %148 : vector<1x32xf32>
    %cst_28 = arith.constant 1.000000e+00 : f32
    %150 = vector.broadcast %cst_28 : f32 to vector<1x32xf32>
    %151 = arith.addf %150, %149 : vector<1x32xf32>
    %152 = arith.divf %150, %151 : vector<1x32xf32>
    %153 = vector.extract_strided_slice %11 {offsets = [5, 0], sizes = [1, 32], strides = [1, 1]} : vector<8x32xf32> to vector<1x32xf32>
    %154 = vector.extract_strided_slice %144 {offsets = [0, 32], sizes = [1, 32], strides = [1, 1]} : vector<1x96xf32> to vector<1x32xf32>
    %155 = arith.addf %153, %154 : vector<1x32xf32>
    %156 = arith.negf %155 : vector<1x32xf32>
    %157 = math.exp %156 : vector<1x32xf32>
    %cst_29 = arith.constant 1.000000e+00 : f32
    %158 = vector.broadcast %cst_29 : f32 to vector<1x32xf32>
    %159 = arith.addf %158, %157 : vector<1x32xf32>
    %160 = arith.divf %158, %159 : vector<1x32xf32>
    %161 = vector.extract_strided_slice %12 {offsets = [5, 0], sizes = [1, 32], strides = [1, 1]} : vector<8x32xf32> to vector<1x32xf32>
    %162 = vector.extract_strided_slice %144 {offsets = [0, 64], sizes = [1, 32], strides = [1, 1]} : vector<1x96xf32> to vector<1x32xf32>
    %163 = arith.addf %162, %4 : vector<1x32xf32>
    %164 = arith.mulf %152, %163 : vector<1x32xf32>
    %165 = arith.addf %161, %164 : vector<1x32xf32>
    %166 = math.tanh %165 : vector<1x32xf32>
    %cst_30 = arith.constant 1.000000e+00 : f32
    %167 = vector.broadcast %cst_30 : f32 to vector<1x32xf32>
    %168 = arith.subf %167, %160 : vector<1x32xf32>
    %169 = arith.mulf %168, %166 : vector<1x32xf32>
    %170 = arith.mulf %160, %143 : vector<1x32xf32>
    %171 = arith.addf %169, %170 : vector<1x32xf32>
    %cst_31 = arith.constant dense<0.000000e+00> : vector<1x96xf32>
    %172 = tpu.matmul %171, %2, %cst_31 {dimension_numbers = #tpu.dot_dimension_numbers<[1], [0], [0], [1], [0, 0, 1, 1], [], []>} : vector<1x32xf32>, vector<32x96xf32>, vector<1x96xf32> -> vector<1x96xf32>
    %173 = vector.extract_strided_slice %10 {offsets = [6, 0], sizes = [1, 32], strides = [1, 1]} : vector<8x32xf32> to vector<1x32xf32>
    %174 = vector.extract_strided_slice %172 {offsets = [0, 0], sizes = [1, 32], strides = [1, 1]} : vector<1x96xf32> to vector<1x32xf32>
    %175 = arith.addf %173, %174 : vector<1x32xf32>
    %176 = arith.negf %175 : vector<1x32xf32>
    %177 = math.exp %176 : vector<1x32xf32>
    %cst_32 = arith.constant 1.000000e+00 : f32
    %178 = vector.broadcast %cst_32 : f32 to vector<1x32xf32>
    %179 = arith.addf %178, %177 : vector<1x32xf32>
    %180 = arith.divf %178, %179 : vector<1x32xf32>
    %181 = vector.extract_strided_slice %11 {offsets = [6, 0], sizes = [1, 32], strides = [1, 1]} : vector<8x32xf32> to vector<1x32xf32>
    %182 = vector.extract_strided_slice %172 {offsets = [0, 32], sizes = [1, 32], strides = [1, 1]} : vector<1x96xf32> to vector<1x32xf32>
    %183 = arith.addf %181, %182 : vector<1x32xf32>
    %184 = arith.negf %183 : vector<1x32xf32>
    %185 = math.exp %184 : vector<1x32xf32>
    %cst_33 = arith.constant 1.000000e+00 : f32
    %186 = vector.broadcast %cst_33 : f32 to vector<1x32xf32>
    %187 = arith.addf %186, %185 : vector<1x32xf32>
    %188 = arith.divf %186, %187 : vector<1x32xf32>
    %189 = vector.extract_strided_slice %12 {offsets = [6, 0], sizes = [1, 32], strides = [1, 1]} : vector<8x32xf32> to vector<1x32xf32>
    %190 = vector.extract_strided_slice %172 {offsets = [0, 64], sizes = [1, 32], strides = [1, 1]} : vector<1x96xf32> to vector<1x32xf32>
    %191 = arith.addf %190, %4 : vector<1x32xf32>
    %192 = arith.mulf %180, %191 : vector<1x32xf32>
    %193 = arith.addf %189, %192 : vector<1x32xf32>
    %194 = math.tanh %193 : vector<1x32xf32>
    %cst_34 = arith.constant 1.000000e+00 : f32
    %195 = vector.broadcast %cst_34 : f32 to vector<1x32xf32>
    %196 = arith.subf %195, %188 : vector<1x32xf32>
    %197 = arith.mulf %196, %194 : vector<1x32xf32>
    %198 = arith.mulf %188, %171 : vector<1x32xf32>
    %199 = arith.addf %197, %198 : vector<1x32xf32>
    %cst_35 = arith.constant dense<0.000000e+00> : vector<1x96xf32>
    %200 = tpu.matmul %199, %2, %cst_35 {dimension_numbers = #tpu.dot_dimension_numbers<[1], [0], [0], [1], [0, 0, 1, 1], [], []>} : vector<1x32xf32>, vector<32x96xf32>, vector<1x96xf32> -> vector<1x96xf32>
    %201 = vector.extract_strided_slice %10 {offsets = [7, 0], sizes = [1, 32], strides = [1, 1]} : vector<8x32xf32> to vector<1x32xf32>
    %202 = vector.extract_strided_slice %200 {offsets = [0, 0], sizes = [1, 32], strides = [1, 1]} : vector<1x96xf32> to vector<1x32xf32>
    %203 = arith.addf %201, %202 : vector<1x32xf32>
    %204 = arith.negf %203 : vector<1x32xf32>
    %205 = math.exp %204 : vector<1x32xf32>
    %cst_36 = arith.constant 1.000000e+00 : f32
    %206 = vector.broadcast %cst_36 : f32 to vector<1x32xf32>
    %207 = arith.addf %206, %205 : vector<1x32xf32>
    %208 = arith.divf %206, %207 : vector<1x32xf32>
    %209 = vector.extract_strided_slice %11 {offsets = [7, 0], sizes = [1, 32], strides = [1, 1]} : vector<8x32xf32> to vector<1x32xf32>
    %210 = vector.extract_strided_slice %200 {offsets = [0, 32], sizes = [1, 32], strides = [1, 1]} : vector<1x96xf32> to vector<1x32xf32>
    %211 = arith.addf %209, %210 : vector<1x32xf32>
    %212 = arith.negf %211 : vector<1x32xf32>
    %213 = math.exp %212 : vector<1x32xf32>
    %cst_37 = arith.constant 1.000000e+00 : f32
    %214 = vector.broadcast %cst_37 : f32 to vector<1x32xf32>
    %215 = arith.addf %214, %213 : vector<1x32xf32>
    %216 = arith.divf %214, %215 : vector<1x32xf32>
    %217 = vector.extract_strided_slice %12 {offsets = [7, 0], sizes = [1, 32], strides = [1, 1]} : vector<8x32xf32> to vector<1x32xf32>
    %218 = vector.extract_strided_slice %200 {offsets = [0, 64], sizes = [1, 32], strides = [1, 1]} : vector<1x96xf32> to vector<1x32xf32>
    %219 = arith.addf %218, %4 : vector<1x32xf32>
    %220 = arith.mulf %208, %219 : vector<1x32xf32>
    %221 = arith.addf %217, %220 : vector<1x32xf32>
    %222 = math.tanh %221 : vector<1x32xf32>
    %cst_38 = arith.constant 1.000000e+00 : f32
    %223 = vector.broadcast %cst_38 : f32 to vector<1x32xf32>
    %224 = arith.subf %223, %216 : vector<1x32xf32>
    %225 = arith.mulf %224, %222 : vector<1x32xf32>
    %226 = arith.mulf %216, %199 : vector<1x32xf32>
    %227 = arith.addf %225, %226 : vector<1x32xf32>
    %228 = tpu.concatenate %31, %59, %87, %115, %143, %171, %199, %227 in 0 : vector<1x32xf32>, vector<1x32xf32>, vector<1x32xf32>, vector<1x32xf32>, vector<1x32xf32>, vector<1x32xf32>, vector<1x32xf32>, vector<1x32xf32> -> vector<8x32xf32>
    %cst_39 = arith.constant dense<0.000000e+00> : vector<8x2xf32>
    %229 = tpu.matmul %228, %5, %cst_39 {dimension_numbers = #tpu.dot_dimension_numbers<[1], [0], [0], [1], [0, 0, 1, 1], [], []>} : vector<8x32xf32>, vector<32x2xf32>, vector<8x2xf32> -> vector<8x2xf32>
    %230 = vector.broadcast %6 : vector<1x2xf32> to vector<8x2xf32>
    %231 = arith.addf %229, %230 : vector<8x2xf32>
    %232 = vector.extract_strided_slice %231 {offsets = [0, 0], sizes = [8, 1], strides = [1, 1]} : vector<8x2xf32> to vector<8x1xf32>
    %233 = vector.extract_strided_slice %231 {offsets = [0, 1], sizes = [8, 1], strides = [1, 1]} : vector<8x2xf32> to vector<8x1xf32>
    %234 = arith.subf %232, %233 : vector<8x1xf32>
    %235 = arith.negf %234 : vector<8x1xf32>
    %236 = math.exp %235 : vector<8x1xf32>
    %cst_40 = arith.constant 1.000000e+00 : f32
    %237 = vector.broadcast %cst_40 : f32 to vector<8x1xf32>
    %238 = arith.addf %237, %236 : vector<8x1xf32>
    %239 = arith.divf %237, %238 : vector<8x1xf32>
    %cst_41 = arith.constant 1.000000e+00 : f32
    %240 = vector.broadcast %cst_41 : f32 to vector<8x1xf32>
    %241 = arith.subf %240, %239 : vector<8x1xf32>
    %242 = tpu.concatenate %239, %241 in 1 : vector<8x1xf32>, vector<8x1xf32> -> vector<8x2xf32>
    %c0_42 = arith.constant 0 : index
    %c0_43 = arith.constant 0 : index
    %243 = vector.load %arg2[%c0_42, %c0_43] : memref<8x2xf32, #tpu.memory_space<vmem>>, vector<8x2xf32>
    tpu.vector_store %arg2[%c0_42, %c0_43], %242 {strides = array<i32>} : memref<8x2xf32, #tpu.memory_space<vmem>>, vector<8x2xf32>,
    return
  }
}

</mosaic_0001>

<bundles_post_ra>
// kernel: tpu_custom_call.1
= control target key start
LH: loop header
LB: loop body
LE: loop exit
PB: predicated region body
PF: predicated region fallthrough
CT: control target
= control target key end

     0   :  { %7 = vsyncpa [#allocation3], 0  ;;  %s1495_s0 = inlined_call_operand.hbm [shape: f32[8,16], index: 0, kind: input, shape index: {}]   ;;  %s1496_s1 = inlined_call_operand.hbm [shape: f32[96,128], index: 1, kind: input, shape index: {}]   ;;  %s1497_s2 = inlined_call_operand.vmem [shape: f32[8,2], index: 2, kind: output, shape index: {}]  }
   0x1   :  { %8 = vsyncpa [#allocation5], 0  ;;  %s1300_s9 = smov [#allocation2]   ;;  %s1301_s11 = smov [#allocation4]  }
   0x2   :  { %s15_s10 = sshll.u32 %s1300_s9, 4  ;;  %s24_s12 = sshll.u32 %s1301_s11, 4  ;;  %s16_s10 = int_to_ptr.vmem [resolvable:$true] %s15_s10  ;;  %s25_s12 = int_to_ptr.vmem [resolvable:$true] %s24_s12 }
   0x3   :  { %s1264_s13 = scalar_lea.vmem %s16_s10, 128  ;;  %p1269_p1 = scmp.lt.s32.totalorder %s16_s10, %s16_s10 }
   0x4   :  { %p1265_p0 = scmp.ne.s32.totalorder %s16_s10, %s1264_s13  ;;  %p1270_p2 = scmp.lt.s32.totalorder %s1264_s13, %s1264_s13 }
   0x6   :  { %p1271_p3 = por %p1270_p2, %p1269_p1 }
   0x8   :  { %p1272_p4 = pnand %p1271_p3, %p1265_p0 }
   0xa   :  { %1275 = shalt.err (!%p1272_p4)
}
   0xb   :  { %18 = dma.hbm_to_vmem [thread:$0]  %s1495_s0, 128, %s16_s10, [#allocation3]  }
   0xc   :  { %s1284_s16 = scalar_lea.vmem %s25_s12, 1536  ;;  %p1289_p6 = scmp.lt.s32.totalorder %s25_s12, %s25_s12 }
   0xd   :  { %p1285_p5 = scmp.ne.s32.totalorder %s25_s12, %s1284_s16  ;;  %p1290_p7 = scmp.lt.s32.totalorder %s1284_s16, %s1284_s16 }
   0xf   :  { %p1291_p8 = por %p1290_p7, %p1289_p6 }
  0x11   :  { %p1292_p9 = pnand %p1291_p8, %p1285_p5 }
  0x13   :  { %1295 = shalt.err (!%p1292_p9)
}
  0x14   :  { %s1302_s17 = smov 128   ;;  %s1303_s18 = smov 8  }
  0x15   :  { %30 = dma.hbm_to_vmem [thread:$0]  %s1496_s1, 1536, %s25_s12, [#allocation5], %s1302_s17, %s1302_s17, %s1303_s18  }
  0x16   :  { %1296 = dma.done.wait [#allocation3], 128  }
  0x17   :  { %1297 = vsyncadd [#allocation3], 4294967168 }
  0x18   :  { %1298 = dma.done.wait [#allocation5], 1536  }
  0x19   :  { %1299 = vsyncadd [#allocation5], 4294965760  ;;  %v1304_v0 = vmov 0.0   ;;  %vm1305_vm0 = vmmov 0   ;;  %v39_v1 = vld [vmem:[#allocation4 + $0x8] sm:$0xff]  ;;  %v38_v2 = vld [vmem:[#allocation4] sm:$0xff]  ;;  %v50_v5 = vlaneseq }
  0x1a   :  { %1098 = vmatprep.subr.mxu0 %v1304_v0  ;;  %1102 = vmatprep.mubr.msk.f32.mxu0 %vm1305_vm0, %v1304_v0  ;;  %v37_v3 = vld [vmem:[#allocation2] sm:$0xff]  ;;  %vm54_vm1 = vcmask 130048   ;;  %v44_v4 = vld [vmem:[#allocation4 + $0x30] sm:$0x1]  ;;  %s1306_s0 = smov 32   ;;  %s1307_s1 = smov 64  }
  0x1b   :  { %1105 = vmatprep.subr.mxu1 %v1304_v0  ;;  %1113 = vmatprep.mubr.msk.f32.mxu1 %vm1305_vm0, %v1304_v0  ;;  %v51_v6 = vshrl.u32 %v50_v5, 7  ;;  %s1308_s21 = smov 96   ;;  %v1348_v20 = vld [vmem:[#allocation4 + $0x28] sm:$0xff]  ;;  %v1350_v21 = vld [vmem:[#allocation4 + $0x20] sm:$0xff]  ;;  %v1355_v22 = vld [vmem:[#allocation4 + $0x18] sm:$0xff]  ;;  %vm154_vm2 = vcmask 261120  }
  0x1c   :  { %1099 = vmatpush3.msra.mxu0 %v39_v1  ;;  %135 = vrot.lane.b32.xlu0 %v44_v4, %s1306_s0  ;;  %v1361_v23 = vld [vmem:[#allocation4 + $0x10] sm:$0xff]  ;;  %vm917_vm3 = vcmask 1040384   ;;  %vm919_vm4 = vcmask 1041408   ;;  %vm921_vm5 = vcmask 1042432   ;;  %vm923_vm6 = vcmask 1043456   ;;  %s1309_s22 = smov 127  }
  0x1d   :  { %1100 = vmatprep.subr.mxu0 %v1304_v0  ;;  %v52_v7 = vsub.s32 0, %v51_v6  ;;  %1106 = vmatpush3.msra.mxu1 %v1348_v20  ;;  %vm925_vm7 = vcmask 1044480   ;;  %vm927_vm8 = vcmask 1045504   ;;  %vm929_vm9 = vcmask 1046528   ;;  %s1310_s23 = smov 1  }
  0x1e   :  { %1101 = vmatpush3.msra.mxu0 %v38_v2  ;;  %1107 = vmatprep.subr.mxu1 %v1304_v0  ;;  %vm1026_vm10 = vcmask 7168   ;;  %vm1028_vm11 = vcmask 15360  }
  0x1f   :  { %1103 = vmatmul.mubr.msk.f32.vlgmr.msra.gmra.mxu0 %vm54_vm1, %v37_v3  ;;  %1116 = vmatprep.subr.mxu0 %v1304_v0  ;;  %v53_v8 = vrot.slane %v44_v4, %v52_v7 }
  0x20   :  { %1124 = vmatprep.mubr.msk.f32.mxu0 %vm1305_vm0, %v1304_v0  ;;  %1117 = vmatpush3.msra.mxu0 %v1348_v20 }
  0x21   :  { %1118 = vmatprep.subr.mxu0 %v1304_v0  ;;  %1108 = vmatpush3.msra.mxu1 %v1350_v21 }
  0x22   :  { %1119 = vmatpush3.msra.mxu0 %v1350_v21  ;;  %1109 = vmatprep.subr.mxu1 %v1304_v0 }
  0x23   :  { %1120 = vmatprep.subr.mxu0 %v1304_v0  ;;  %1110 = vmatpush3.msra.mxu1 %v1355_v22 }
  0x24   :  { %1121 = vmatpush3.msra.mxu0 %v1355_v22  ;;  %1111 = vmatprep.subr.mxu1 %v1304_v0 }
  0x25   :  { %1122 = vmatprep.subr.mxu0 %v1304_v0  ;;  %1112 = vmatpush3.msra.mxu1 %v1361_v23 }
  0x26   :  { %1123 = vmatpush3.msra.mxu0 %v1361_v23  ;;  %1127 = vmatprep.subr.mxu1 %v1304_v0 }
  0x27   :  { %1138 = vmatprep.subr.mxu0 %v1304_v0 }
  0x8e   :  { %v136_v15 = vpop.permute.xlu0 %135 }
  0xdf   :  { %v124_v9 = vpop.f32.mrf.mxu0 }
  0xe0   :  { %v1342_v10 = vadd.f32 %v124_v9, %v53_v8 }
  0xe1   :  { %v1104_v11 = vpop.f32.mrf.mxu0 }
  0xe2   :  { %v1037_v12 = vmul.f32 -1.442695, %v1342_v10 }
  0xe4   :  { %1204 = vpow2.f32 %v1037_v12 }
  0xf1   :  { %v1205_v13 = vpop.eup %1204 }
  0xf2   :  { %v131_v14 = vadd.f32 1.0, %v1205_v13 }
  0xf4   :  { %1206 = vrcp.f32 %v131_v14 }
 0x101   :  { %v1207_v16 = vpop.eup %1206 }
 0x102   :  { %v138_v17 = vmul.f32 %v1207_v16, %v136_v15  ;;  %v145_v25 = vsub.f32 1.0, %v1207_v16 }
 0x104   :  { %140 = vrot.lane.b32.xlu0 %v138_v17, %s1307_s1 }
 0x108   :  { %237 = vrot.lane.b32.xlu0 %v44_v4, %s1308_s21 }
 0x176   :  { %v141_v18 = vpop.permute.xlu0 %140 }
 0x177   :  { %v143_v19 = vadd.f32 %v141_v18, %v1342_v10 }
 0x179   :  { %1208 = vtanh.f32 %v143_v19 }
 0x17a   :  { %v1388_v29 = vpop.permute.xlu0 %237 }
 0x186   :  { %v1209_v24 = vpop.eup %1208 }
 0x187   :  { %147 = vrot.lane.b32.xlu1 %v1209_v24, %s1308_s21 }
 0x1f9   :  { %v148_v26 = vpop.permute.xlu1 %147 }
 0x1fa   :  { %v1373_v27 = vmul.f32 %v148_v26, %v145_v25 }
 0x1fc   :  { %152 = vrot.lane.b32.xlu1 %v1373_v27, %s1308_s21  ;;  %v259_v45 = vrot.slane %v1373_v27, 7 }
 0x26e   :  { %v153_v28 = vpop.permute.xlu1 %152 }
 0x26f   :  { %1114 = vmatmul.mubr.msk.f32.vlgmr.msra.gmra.mxu1 %vm154_vm2, %v153_v28 }
 0x270   :  { %1128 = vmatpush3.msra.mxu1 %v1348_v20  ;;  %1135 = vmatprep.mubr.msk.f32.mxu1 %vm1305_vm0, %v1304_v0 }
 0x271   :  { %1129 = vmatprep.subr.mxu1 %v1304_v0 }
 0x272   :  { %1130 = vmatpush3.msra.mxu1 %v1350_v21 }
 0x273   :  { %1131 = vmatprep.subr.mxu1 %v1304_v0 }
 0x274   :  { %1132 = vmatpush3.msra.mxu1 %v1355_v22 }
 0x275   :  { %1133 = vmatprep.subr.mxu1 %v1304_v0 }
 0x276   :  { %1134 = vmatpush3.msra.mxu1 %v1361_v23 }
 0x277   :  { %1149 = vmatprep.subr.mxu1 %v1304_v0 }
 0x32f   :  { %v223_v30 = vpop.f32.mrf.mxu1 }
 0x330   :  { %v240_v31 = vadd.f32 %v1388_v29, %v223_v30  ;;  %v228_v34 = vrot.slane %v223_v30, 7 }
 0x331   :  { %v1115_v32 = vpop.f32.mrf.mxu1 }
 0x332   :  { %v242_v33 = vrot.slane %v240_v31, 7  ;;  %v230_v35 = vadd.f32 %v228_v34, %v1342_v10 }
 0x334   :  { %243 = vrot.lane.b32.xlu1 %v242_v33, %s1307_s1  ;;  %v1039_v36 = vmul.f32 -1.442695, %v230_v35 }
 0x336   :  { %1210 = vpow2.f32 %v1039_v36 }
 0x343   :  { %v1211_v37 = vpop.eup %1210 }
 0x344   :  { %v234_v38 = vadd.f32 1.0, %v1211_v37 }
 0x346   :  { %1212 = vrcp.f32 %v234_v38 }
 0x353   :  { %v1213_v39 = vpop.eup %1212 }
 0x354   :  { %v253_v46 = vsub.f32 1.0, %v1213_v39  ;;  %v261_v48 = vmul.f32 %v1213_v39, %v259_v45 }
 0x3a6   :  { %v244_v40 = vpop.permute.xlu1 %243 }
 0x3a7   :  { %v246_v41 = vmul.f32 %v1213_v39, %v244_v40 }
 0x3a9   :  { %248 = vrot.lane.b32.xlu0 %v246_v41, %s1307_s1 }
 0x41b   :  { %v249_v42 = vpop.permute.xlu0 %248 }
 0x41c   :  { %v251_v43 = vadd.f32 %v249_v42, %v1342_v10 }
 0x41e   :  { %1214 = vtanh.f32 %v251_v43 }
 0x42b   :  { %v1215_v44 = vpop.eup %1214 }
 0x42c   :  { %255 = vrot.lane.b32.xlu1 %v1215_v44, %s1308_s21 }
 0x49e   :  { %v256_v47 = vpop.permute.xlu1 %255 }
 0x49f   :  { %v258_v49 = vmul.f32 %v256_v47, %v253_v46 }
 0x4a1   :  { %v262_v50 = vadd.f32 %v261_v48, %v258_v49 }
 0x4a3   :  { %v264_v51 = vrot.slane %v262_v50, 1  ;;  %v368_v6 = vrot.slane %v262_v50, 7  ;;  %v918_v12 = vsel %vm917_vm3, %v1373_v27, %v262_v50 }
 0x4a5   :  { %265 = vrot.lane.b32.xlu0 %v264_v51, %s1308_s21 }
 0x517   :  { %v266_v52 = vpop.permute.xlu0 %265 }
 0x518   :  { %1125 = vmatmul.mubr.msk.f32.vlgmr.msra.gmra.mxu0 %vm154_vm2, %v266_v52 }
 0x519   :  { %1139 = vmatpush3.msra.mxu0 %v1348_v20  ;;  %1146 = vmatprep.mubr.msk.f32.mxu0 %vm1305_vm0, %v1304_v0 }
 0x51a   :  { %1140 = vmatprep.subr.mxu0 %v1304_v0 }
 0x51b   :  { %1141 = vmatpush3.msra.mxu0 %v1350_v21 }
 0x51c   :  { %1142 = vmatprep.subr.mxu0 %v1304_v0 }
 0x51d   :  { %1143 = vmatpush3.msra.mxu0 %v1355_v22 }
 0x51e   :  { %1144 = vmatprep.subr.mxu0 %v1304_v0 }
 0x51f   :  { %1145 = vmatpush3.msra.mxu0 %v1361_v23 }
 0x520   :  { %1160 = vmatprep.subr.mxu0 %v1304_v0 }
 0x5d8   :  { %v335_v53 = vpop.f32.mrf.mxu0 }
 0x5d9   :  { %v349_v54 = vadd.f32 %v335_v53, %v1388_v29  ;;  %v340_v57 = vrot.slane %v335_v53, 6 }
 0x5da   :  { %v1126_v55 = vpop.f32.mrf.mxu0 }
 0x5db   :  { %v351_v56 = vrot.slane %v349_v54, 6  ;;  %v342_v58 = vadd.f32 %v340_v57, %v1342_v10 }
 0x5dd   :  { %352 = vrot.lane.b32.xlu1 %v351_v56, %s1307_s1  ;;  %v1041_v59 = vmul.f32 -1.442695, %v342_v58 }
 0x5df   :  { %1216 = vpow2.f32 %v1041_v59 }
 0x5ec   :  { %v1217_v60 = vpop.eup %1216 }
 0x5ed   :  { %v346_v61 = vadd.f32 1.0, %v1217_v60 }
 0x5ef   :  { %1218 = vrcp.f32 %v346_v61 }
 0x5fc   :  { %v1219_v62 = vpop.eup %1218 }
 0x5fd   :  { %v362_v5 = vsub.f32 1.0, %v1219_v62  ;;  %v370_v8 = vmul.f32 %v1219_v62, %v368_v6 }
 0x64f   :  { %v353_v63 = vpop.permute.xlu1 %352 }
 0x650   :  { %v355_v1 = vmul.f32 %v1219_v62, %v353_v63 }
 0x652   :  { %357 = vrot.lane.b32.xlu0 %v355_v1, %s1307_s1 }
 0x6c4   :  { %v358_v2 = vpop.permute.xlu0 %357 }
 0x6c5   :  { %v360_v3 = vadd.f32 %v358_v2, %v1342_v10 }
 0x6c7   :  { %1220 = vtanh.f32 %v360_v3 }
 0x6d4   :  { %v1221_v4 = vpop.eup %1220 }
 0x6d5   :  { %364 = vrot.lane.b32.xlu1 %v1221_v4, %s1308_s21 }
 0x747   :  { %v365_v7 = vpop.permute.xlu1 %364 }
 0x748   :  { %v367_v9 = vmul.f32 %v365_v7, %v362_v5 }
 0x74a   :  { %v371_v11 = vadd.f32 %v370_v8, %v367_v9 }
 0x74c   :  { %v920_v13 = vsel %vm919_vm4, %v918_v12, %v371_v11  ;;  %v373_v14 = vrot.slane %v371_v11, 2  ;;  %v477_v37 = vrot.slane %v371_v11, 7 }
 0x74e   :  { %374 = vrot.lane.b32.xlu0 %v373_v14, %s1308_s21 }
 0x7c0   :  { %v375_v15 = vpop.permute.xlu0 %374 }
 0x7c1   :  { %1136 = vmatmul.mubr.msk.f32.vlgmr.msra.gmra.mxu1 %vm154_vm2, %v375_v15 }
 0x7c2   :  { %1150 = vmatpush3.msra.mxu1 %v1348_v20  ;;  %1157 = vmatprep.mubr.msk.f32.mxu1 %vm1305_vm0, %v1304_v0 }
 0x7c3   :  { %1151 = vmatprep.subr.mxu1 %v1304_v0 }
 0x7c4   :  { %1152 = vmatpush3.msra.mxu1 %v1350_v21 }
 0x7c5   :  { %1153 = vmatprep.subr.mxu1 %v1304_v0 }
 0x7c6   :  { %1154 = vmatpush3.msra.mxu1 %v1355_v22 }
 0x7c7   :  { %1155 = vmatprep.subr.mxu1 %v1304_v0 }
 0x7c8   :  { %1156 = vmatpush3.msra.mxu1 %v1361_v23 }
 0x7c9   :  { %1171 = vmatprep.subr.mxu1 %v1304_v0 }
 0x881   :  { %v444_v16 = vpop.f32.mrf.mxu1 }
 0x882   :  { %v458_v17 = vadd.f32 %v444_v16, %v1388_v29  ;;  %v449_v24 = vrot.slane %v444_v16, 5 }
 0x883   :  { %v1137_v18 = vpop.f32.mrf.mxu1 }
 0x884   :  { %v460_v19 = vrot.slane %v458_v17, 5  ;;  %v451_v25 = vadd.f32 %v449_v24, %v1342_v10 }
 0x886   :  { %461 = vrot.lane.b32.xlu1 %v460_v19, %s1307_s1  ;;  %v1043_v26 = vmul.f32 -1.442695, %v451_v25 }
 0x888   :  { %1222 = vpow2.f32 %v1043_v26 }
 0x895   :  { %v1223_v27 = vpop.eup %1222 }
 0x896   :  { %v455_v28 = vadd.f32 1.0, %v1223_v27 }
 0x898   :  { %1224 = vrcp.f32 %v455_v28 }
 0x8a5   :  { %v1225_v30 = vpop.eup %1224 }
 0x8a6   :  { %v471_v36 = vsub.f32 1.0, %v1225_v30  ;;  %v479_v39 = vmul.f32 %v1225_v30, %v477_v37 }
 0x8f8   :  { %v462_v31 = vpop.permute.xlu1 %461 }
 0x8f9   :  { %v464_v32 = vmul.f32 %v1225_v30, %v462_v31 }
 0x8fb   :  { %466 = vrot.lane.b32.xlu0 %v464_v32, %s1307_s1 }
 0x96d   :  { %v467_v33 = vpop.permute.xlu0 %466 }
 0x96e   :  { %v469_v34 = vadd.f32 %v467_v33, %v1342_v10 }
 0x970   :  { %1226 = vtanh.f32 %v469_v34 }
 0x97d   :  { %v1227_v35 = vpop.eup %1226 }
 0x97e   :  { %473 = vrot.lane.b32.xlu1 %v1227_v35, %s1308_s21 }
 0x9f0   :  { %v474_v38 = vpop.permute.xlu1 %473 }
 0x9f1   :  { %v476_v40 = vmul.f32 %v474_v38, %v471_v36 }
 0x9f3   :  { %v480_v41 = vadd.f32 %v479_v39, %v476_v40 }
 0x9f5   :  { %v922_v42 = vsel %vm921_vm5, %v920_v13, %v480_v41  ;;  %v482_v43 = vrot.slane %v480_v41, 3  ;;  %v586_v61 = vrot.slane %v480_v41, 7 }
 0x9f7   :  { %483 = vrot.lane.b32.xlu0 %v482_v43, %s1308_s21 }
 0xa69   :  { %v484_v44 = vpop.permute.xlu0 %483 }
 0xa6a   :  { %1147 = vmatmul.mubr.msk.f32.vlgmr.msra.gmra.mxu0 %vm154_vm2, %v484_v44 }
 0xa6b   :  { %1161 = vmatpush3.msra.mxu0 %v1348_v20  ;;  %1168 = vmatprep.mubr.msk.f32.mxu0 %vm1305_vm0, %v1304_v0 }
 0xa6c   :  { %1162 = vmatprep.subr.mxu0 %v1304_v0 }
 0xa6d   :  { %1163 = vmatpush3.msra.mxu0 %v1350_v21 }
 0xa6e   :  { %1164 = vmatprep.subr.mxu0 %v1304_v0 }
 0xa6f   :  { %1165 = vmatpush3.msra.mxu0 %v1355_v22 }
 0xa70   :  { %1166 = vmatprep.subr.mxu0 %v1304_v0 }
 0xa71   :  { %1167 = vmatpush3.msra.mxu0 %v1361_v23 }
 0xa72   :  { %1182 = vmatprep.subr.mxu0 %v1304_v0 }
 0xb2a   :  { %v553_v45 = vpop.f32.mrf.mxu0 }
 0xb2b   :  { %v567_v46 = vadd.f32 %v553_v45, %v1388_v29  ;;  %v558_v49 = vrot.slane %v553_v45, 4 }
 0xb2c   :  { %v1148_v47 = vpop.f32.mrf.mxu0 }
 0xb2d   :  { %v569_v48 = vrot.slane %v567_v46, 4  ;;  %v560_v50 = vadd.f32 %v558_v49, %v1342_v10 }
 0xb2f   :  { %570 = vrot.lane.b32.xlu1 %v569_v48, %s1307_s1  ;;  %v1045_v51 = vmul.f32 -1.442695, %v560_v50 }
 0xb31   :  { %1228 = vpow2.f32 %v1045_v51 }
 0xb3e   :  { %v1229_v52 = vpop.eup %1228 }
 0xb3f   :  { %v564_v53 = vadd.f32 1.0, %v1229_v52 }
 0xb41   :  { %1230 = vrcp.f32 %v564_v53 }
 0xb4e   :  { %v1231_v54 = vpop.eup %1230 }
 0xb4f   :  { %v580_v60 = vsub.f32 1.0, %v1231_v54  ;;  %v588_v63 = vmul.f32 %v1231_v54, %v586_v61 }
 0xba1   :  { %v571_v55 = vpop.permute.xlu1 %570 }
 0xba2   :  { %v573_v56 = vmul.f32 %v1231_v54, %v571_v55 }
 0xba4   :  { %575 = vrot.lane.b32.xlu0 %v573_v56, %s1307_s1 }
 0xc16   :  { %v576_v57 = vpop.permute.xlu0 %575 }
 0xc17   :  { %v578_v58 = vadd.f32 %v576_v57, %v1342_v10 }
 0xc19   :  { %1232 = vtanh.f32 %v578_v58 }
 0xc26   :  { %v1233_v59 = vpop.eup %1232 }
 0xc27   :  { %582 = vrot.lane.b32.xlu1 %v1233_v59, %s1308_s21 }
 0xc99   :  { %v583_v62 = vpop.permute.xlu1 %582 }
 0xc9a   :  { %v585_v1 = vmul.f32 %v583_v62, %v580_v60 }
 0xc9c   :  { %v589_v2 = vadd.f32 %v588_v63, %v585_v1 }
 0xc9e   :  { %v924_v3 = vsel %vm923_vm6, %v922_v42, %v589_v2  ;;  %v591_v4 = vrot.slane %v589_v2, 4  ;;  %v695_v19 = vrot.slane %v589_v2, 7 }
 0xca0   :  { %592 = vrot.lane.b32.xlu0 %v591_v4, %s1308_s21 }
 0xd12   :  { %v593_v5 = vpop.permute.xlu0 %592 }
 0xd13   :  { %1158 = vmatmul.mubr.msk.f32.vlgmr.msra.gmra.mxu1 %vm154_vm2, %v593_v5 }
 0xd14   :  { %1172 = vmatpush3.msra.mxu1 %v1348_v20  ;;  %1179 = vmatprep.mubr.msk.f32.mxu1 %vm1305_vm0, %v1304_v0 }
 0xd15   :  { %1173 = vmatprep.subr.mxu1 %v1304_v0 }
 0xd16   :  { %1174 = vmatpush3.msra.mxu1 %v1350_v21 }
 0xd17   :  { %1175 = vmatprep.subr.mxu1 %v1304_v0 }
 0xd18   :  { %1176 = vmatpush3.msra.mxu1 %v1355_v22 }
 0xd19   :  { %1177 = vmatprep.subr.mxu1 %v1304_v0 }
 0xd1a   :  { %1178 = vmatpush3.msra.mxu1 %v1361_v23 }
 0xdd3   :  { %v662_v6 = vpop.f32.mrf.mxu1 }
 0xdd4   :  { %v676_v7 = vadd.f32 %v662_v6, %v1388_v29  ;;  %v667_v9 = vrot.slane %v662_v6, 3  ;;  %v48_v6 = vld [vmem:[#allocation4 + $0x50] sm:$0xff] }
 0xdd5   :  { %v1159_v8 = vpop.f32.mrf.mxu1 }
 0xdd6   :  { %v678_v20 = vrot.slane %v676_v7, 3  ;;  %v669_v11 = vadd.f32 %v667_v9, %v1342_v10  ;;  %v47_v7 = vld [vmem:[#allocation4 + $0x48] sm:$0xff]  ;;  %v46_v8 = vld [vmem:[#allocation4 + $0x40] sm:$0xff] }
 0xdd8   :  { %679 = vrot.lane.b32.xlu1 %v678_v20, %s1307_s1  ;;  %v1047_v12 = vmul.f32 -1.442695, %v669_v11  ;;  %v45_v20 = vld [vmem:[#allocation4 + $0x38] sm:$0xff] }
 0xdda   :  { %1234 = vpow2.f32 %v1047_v12 }
 0xde7   :  { %v1235_v21 = vpop.eup %1234 }
 0xde8   :  { %v673_v13 = vadd.f32 1.0, %v1235_v21 }
 0xdea   :  { %1236 = vrcp.f32 %v673_v13 }
 0xdf7   :  { %v1237_v22 = vpop.eup %1236 }
 0xdf8   :  { %v689_v18 = vsub.f32 1.0, %v1237_v22  ;;  %v697_v25 = vmul.f32 %v1237_v22, %v695_v19 }
 0xe4a   :  { %v680_v14 = vpop.permute.xlu1 %679 }
 0xe4b   :  { %v682_v15 = vmul.f32 %v1237_v22, %v680_v14 }
 0xe4d   :  { %684 = vrot.lane.b32.xlu0 %v682_v15, %s1307_s1 }
 0xebf   :  { %v685_v23 = vpop.permute.xlu0 %684 }
 0xec0   :  { %v687_v16 = vadd.f32 %v685_v23, %v1342_v10  ;;  %v1052_v23 = vld [vmem:[#allocation4 + $0x58] ss:$0 sm:$0xff] }
 0xec2   :  { %1238 = vtanh.f32 %v687_v16 }
 0xecf   :  { %v1239_v17 = vpop.eup %1238 }
 0xed0   :  { %691 = vrot.lane.b32.xlu1 %v1239_v17, %s1308_s21 }
 0xf42   :  { %v692_v24 = vpop.permute.xlu1 %691 }
 0xf43   :  { %v694_v26 = vmul.f32 %v692_v24, %v689_v18 }
 0xf45   :  { %v698_v27 = vadd.f32 %v697_v25, %v694_v26 }
 0xf47   :  { %v700_v28 = vrot.slane %v698_v27, 5  ;;  %v926_v30 = vsel %vm925_vm7, %v924_v3, %v698_v27  ;;  %v804_v48 = vrot.slane %v698_v27, 7 }
 0xf49   :  { %701 = vrot.lane.b32.xlu0 %v700_v28, %s1308_s21 }
 0xfbb   :  { %v702_v31 = vpop.permute.xlu0 %701 }
 0xfbc   :  { %1169 = vmatmul.mubr.msk.f32.vlgmr.msra.gmra.mxu0 %vm154_vm2, %v702_v31 }
 0xfbd   :  { %1190 = vmatprep.mubr.msk.f32.mxu0 %vm1305_vm0, %v1304_v0  ;;  %1183 = vmatpush3.msra.mxu0 %v48_v6 }
 0xfbe   :  { %1184 = vmatprep.subr.mxu0 %v1304_v0 }
 0xfbf   :  { %1185 = vmatpush3.msra.mxu0 %v47_v7 }
 0xfc0   :  { %1186 = vmatprep.subr.mxu0 %v1304_v0 }
 0xfc1   :  { %1187 = vmatpush3.msra.mxu0 %v46_v8 }
 0xfc2   :  { %1188 = vmatprep.subr.mxu0 %v1304_v0 }
 0xfc3   :  { %1189 = vmatpush3.msra.mxu0 %v45_v20 }
0x107c   :  { %v771_v32 = vpop.f32.mrf.mxu0 }
0x107d   :  { %v785_v33 = vadd.f32 %v771_v32, %v1388_v29  ;;  %v776_v36 = vrot.slane %v771_v32, 2 }
0x107e   :  { %v1170_v34 = vpop.f32.mrf.mxu0 }
0x107f   :  { %v787_v35 = vrot.slane %v785_v33, 2  ;;  %v778_v37 = vadd.f32 %v776_v36, %v1342_v10 }
0x1081   :  { %788 = vrot.lane.b32.xlu1 %v787_v35, %s1307_s1  ;;  %v1049_v38 = vmul.f32 -1.442695, %v778_v37 }
0x1083   :  { %1240 = vpow2.f32 %v1049_v38 }
0x1090   :  { %v1241_v39 = vpop.eup %1240 }
0x1091   :  { %v782_v40 = vadd.f32 1.0, %v1241_v39 }
0x1093   :  { %1242 = vrcp.f32 %v782_v40 }
0x10a0   :  { %v1243_v41 = vpop.eup %1242 }
0x10a1   :  { %v798_v47 = vsub.f32 1.0, %v1243_v41  ;;  %v806_v50 = vmul.f32 %v1243_v41, %v804_v48 }
0x10f3   :  { %v789_v42 = vpop.permute.xlu1 %788 }
0x10f4   :  { %v791_v43 = vmul.f32 %v1243_v41, %v789_v42 }
0x10f6   :  { %793 = vrot.lane.b32.xlu0 %v791_v43, %s1307_s1 }
0x1168   :  { %v794_v44 = vpop.permute.xlu0 %793 }
0x1169   :  { %v796_v45 = vadd.f32 %v794_v44, %v1342_v10 }
0x116b   :  { %1244 = vtanh.f32 %v796_v45 }
0x1178   :  { %v1245_v46 = vpop.eup %1244 }
0x1179   :  { %800 = vrot.lane.b32.xlu1 %v1245_v46, %s1308_s21 }
0x11eb   :  { %v801_v49 = vpop.permute.xlu1 %800 }
0x11ec   :  { %v803_v51 = vmul.f32 %v801_v49, %v798_v47 }
0x11ee   :  { %v807_v52 = vadd.f32 %v806_v50, %v803_v51 }
0x11f0   :  { %v809_v53 = vrot.slane %v807_v52, 6  ;;  %v928_v54 = vsel %vm927_vm8, %v926_v30, %v807_v52 }
0x11f2   :  { %810 = vrot.lane.b32.xlu0 %v809_v53, %s1308_s21 }
0x1264   :  { %v811_v55 = vpop.permute.xlu0 %810 }
0x1265   :  { %1180 = vmatmul.mubr.msk.f32.vlgmr.msra.gmra.mxu1 %vm154_vm2, %v811_v55 }
0x1325   :  { %v880_v56 = vpop.f32.mrf.mxu1 }
0x1326   :  { %v894_v57 = vadd.f32 %v880_v56, %v1388_v29  ;;  %v885_v60 = vrot.slane %v880_v56, 1 }
0x1327   :  { %v1181_v58 = vpop.f32.mrf.mxu1 }
0x1328   :  { %v896_v59 = vrot.slane %v894_v57, 1  ;;  %v887_v61 = vadd.f32 %v885_v60, %v1342_v10 }
0x132a   :  { %897 = vrot.lane.b32.xlu1 %v896_v59, %s1307_s1  ;;  %v1051_v62 = vmul.f32 -1.442695, %v887_v61 }
0x132c   :  { %1246 = vpow2.f32 %v1051_v62 }
0x1339   :  { %v1247_v63 = vpop.eup %1246 }
0x133a   :  { %v891_v1 = vadd.f32 1.0, %v1247_v63 }
0x133c   :  { %1248 = vrcp.f32 %v891_v1 }
0x1349   :  { %v1249_v2 = vpop.eup %1248 }
0x134a   :  { %v907_v11 = vsub.f32 1.0, %v1249_v2 }
0x139c   :  { %v898_v3 = vpop.permute.xlu1 %897 }
0x139d   :  { %v900_v4 = vmul.f32 %v1249_v2, %v898_v3 }
0x139f   :  { %902 = vrot.lane.b32.xlu0 %v900_v4, %s1307_s1 }
0x1411   :  { %v903_v5 = vpop.permute.xlu0 %902 }
0x1412   :  { %v905_v29 = vadd.f32 %v903_v5, %v1342_v10  ;;  %v913_v10 = vrot.slane %v807_v52, 7 }
0x1414   :  { %1250 = vtanh.f32 %v905_v29  ;;  %v915_v21 = vmul.f32 %v1249_v2, %v913_v10 }
0x1421   :  { %v1251_v9 = vpop.eup %1250 }
0x1422   :  { %909 = vrot.lane.b32.xlu1 %v1251_v9, %s1308_s21 }
0x1494   :  { %v910_v12 = vpop.permute.xlu1 %909 }
0x1495   :  { %v912_v13 = vmul.f32 %v910_v12, %v907_v11 }
0x1497   :  { %v916_v22 = vadd.f32 %v915_v21, %v912_v13 }
0x1499   :  { %v930_v14 = vsel %vm929_vm9, %v928_v54, %v916_v22 }
0x149a   :  { %936 = vrot.lane.b32.xlu0 %v930_v14, %s1308_s21 }
0x150c   :  { %v937_v15 = vpop.permute.xlu0 %936 }
0x150d   :  { %1191 = vmatmul.mubr.msk.f32.vlgmr.msra.gmra.mxu0 %vm154_vm2, %v937_v15 }
0x15cd   :  { %v1006_v16 = vpop.f32.mrf.mxu0 }
0x15ce   :  { %v1007_v0 = vadd.f32 %v1052_v23, %v1006_v16 }
0x15cf   :  { %v1192_v17 = vpop.f32.mrf.mxu0 }
0x15d0   :  { %1011 = vrot.lane.b32.xlu1 %v1007_v0, %s1309_s22 }
0x1642   :  { %v1012_v18 = vpop.permute.xlu1 %1011 }
0x1643   :  { %v1014_v19 = vsub.f32 %v1007_v0, %v1012_v18 }
0x1645   :  { %v1054_v24 = vmul.f32 -1.442695, %v1014_v19 }
0x1647   :  { %1252 = vpow2.f32 %v1054_v24 }
0x1654   :  { %v1253_v25 = vpop.eup %1252 }
0x1655   :  { %v1018_v26 = vadd.f32 1.0, %v1253_v25 }
0x1657   :  { %1254 = vrcp.f32 %v1018_v26 }
0x1664   :  { %v1255_v27 = vpop.eup %1254 }
0x1665   :  { %v1021_v28 = vsub.f32 1.0, %v1255_v27 }
0x1667   :  { %1023 = vrot.lane.b32.xlu0 %v1021_v28, %s1310_s23 }
0x16d9   :  { %v1024_v30 = vpop.permute.xlu0 %1023 }
0x16da   :  { %v1027_v31 = vsel %vm1026_vm10, %v1255_v27, %v1024_v30 }
0x16db   :  { %1029 = vst.msk [vmem:[%s1497_s2] sm:$0xff] %vm1028_vm11, %v1027_v31 }
0x16dc   :  { %1034 = vsyncpa [#allocation3], 1 }
0x16dd   :  { %1035 = vsyncpa [#allocation5], 1 }

</bundles_post_ra>
